<compile_context>
chip_gen: v6e
topology: v6e:2x2x1
jax: 0.10.0
libtpu: 0.0.40
codegen_flags: <defaults>
</compile_context>

<pallas_src>
import jax
import jax.numpy as jnp
from jax.experimental import pallas as pl
from jax.experimental.pallas import tpu as pltpu


def _round_up(a, b):
    return (a + b - 1) // b * b


def _proj_kernel(x_ref, w_ref, b_ref, o_ref):
    # x_ref: (TM, K) patch rows (compute dtype)
    # w_ref: (K, E)  resident projection weight (compute dtype)
    # b_ref: (1, E)  resident bias (f32)
    # o_ref: (TM, E) output tile (input dtype)
    acc = jnp.dot(x_ref[...], w_ref[...], preferred_element_type=jnp.float32)
    o_ref[...] = (acc + b_ref[...]).astype(o_ref.dtype)


def image_encoder(x, weight, bias, patch_size, *,
                  compute_dtype=jnp.bfloat16, block_m=1024):
    """
    x:      (B, 3, H, W)               float32, NCHW
    weight: (embed_dim, 3*ps*ps)       PyTorch nn.Linear convention
    bias:   (embed_dim,)
    returns (B, num_patches, embed_dim) in x.dtype

    compute_dtype: matmul operand dtype (bf16 by default for MXU rate and
                   halved HBM bytes); accumulation is always f32.
    block_m:       target M-tile (rows of patches) per grid step.
    """
    B, C, H, W = x.shape
    ps = patch_size
    E, K = weight.shape
    assert K == C * ps * ps, "weight in-features must equal C*ps*ps"
    nh, nw = H // ps, W // ps
    P = nh * nw
    M = B * P

    out_dtype = x.dtype
    in_b = jnp.dtype(compute_dtype).itemsize
    out_b = jnp.dtype(out_dtype).itemsize

    # --- patchify (pure layout; transpose + cast fuse into one XLA pass) ---
    # (B, C, nh, ps, nw, ps) -> (B, nh, nw, C, ps, ps) -> (B*P, C*ps*ps)
    patches = x.reshape(B, C, nh, ps, nw, ps)
    patches = jnp.transpose(patches, (0, 2, 4, 1, 3, 5)).reshape(M, K)
    patches = patches.astype(compute_dtype)

    w_t = weight.T.astype(compute_dtype)          # (K, E), stays VMEM-resident
    b2 = bias.astype(jnp.float32).reshape(1, E)   # (1, E), f32 bias add

    # --- M tiling: TM multiple of 8, pad M up to a TM multiple ---
    tm = min(block_m, _round_up(M, 8))
    tm = max(8, (tm // 8) * 8)
    m_pad = _round_up(M, tm)
    if m_pad != M:
        patches = jnp.pad(patches, ((0, m_pad - M), (0, 0)))
    grid = (m_pad // tm,)

    # VMEM budget: double-buffered x/out tiles + (double-buffered) resident
    # weight + bias. Keep the requested limit modest so it is legal on every
    # generation (v5e/v6e: 128 MiB physical, v7x: 64 MiB physical).
    budget = (2 * tm * K * in_b + 2 * tm * E * out_b
              + 2 * K * E * in_b + 2 * E * 4 + (1 << 20))
    vmem_limit = min(max(budget, 32 * 1024 * 1024), 120 * 1024 * 1024)

    cost = pl.CostEstimate(
        flops=2 * M * K * E,
        transcendentals=0,
        bytes_accessed=int(M * K * in_b + K * E * in_b + M * E * out_b + E * 4),
    )

    out = pl.pallas_call(
        _proj_kernel,
        out_shape=jax.ShapeDtypeStruct((m_pad, E), out_dtype),
        grid=grid,
        in_specs=[
            pl.BlockSpec((tm, K), lambda i: (i, 0)),   # streamed patch rows
            pl.BlockSpec((K, E), lambda i: (0, 0)),    # resident weight
            pl.BlockSpec((1, E), lambda i: (0, 0)),    # resident bias
        ],
        out_specs=pl.BlockSpec((tm, E), lambda i: (i, 0)),  # lane-dense (E>=128)
        compiler_params=pltpu.CompilerParams(
            dimension_semantics=("parallel",),   # shard M tiles across TCs (v7x)
            vmem_limit_bytes=vmem_limit,
        ),
        cost_estimate=cost,
    )(patches, w_t, b2)

    if m_pad != M:
        out = out[:M]
    return out.reshape(B, P, E)


if __name__ == "__main__":
    # Small shapes consistent with the module: C must be 3 (proj in = 3*ps*ps).
    B, C, H, W = 2, 3, 16, 16
    patch_size = 8
    embed_dim = 128

    key = jax.random.PRNGKey(0)
    kx, kw, kb = jax.random.split(key, 3)

    x = jax.random.normal(kx, (B, C, H, W), dtype=jnp.float32)
    weight = jax.random.normal(kw, (embed_dim, 3 * patch_size * patch_size),
                               dtype=jnp.float32) * 0.02
    bias = jax.random.normal(kb, (embed_dim,), dtype=jnp.float32) * 0.01

    # Reference (same semantics as the PyTorch forward), plain JAX f32.
    nh, nw = H // patch_size, W // patch_size
    ref = x.reshape(B, C, nh, patch_size, nw, patch_size)
    ref = jnp.transpose(ref, (0, 2, 4, 1, 3, 5)).reshape(B, nh * nw, -1)
    ref = ref @ weight.T + bias

    # Default path: bf16 operands, f32 accumulation.
    out_bf16 = jax.block_until_ready(image_encoder(x, weight, bias, patch_size))
    assert out_bf16.shape == (B, nh * nw, embed_dim)
    assert out_bf16.dtype == x.dtype
    assert jnp.allclose(out_bf16, ref, atol=3e-2, rtol=3e-2)

    # Full-precision path for a tight numerical check.
    out_f32 = jax.block_until_ready(
        image_encoder(x, weight, bias, patch_size, compute_dtype=jnp.float32))
    assert jnp.allclose(out_f32, ref, atol=1e-4, rtol=1e-4)

    print("KERNEL_OK")
</pallas_src>

<mosaic_0001>
module attributes {stable_mosaic.version = 11 : i64} {
  func.func @_proj_kernel(%arg0: i32, %arg1: memref<8x192xbf16, #tpu.memory_space<vmem>>, %arg2: memref<192x128xbf16, #tpu.memory_space<vmem>>, %arg3: memref<1x128xf32, #tpu.memory_space<vmem>>, %arg4: memref<8x128xf32, #tpu.memory_space<vmem>>) attributes {dimension_semantics = [#tpu.dimension_semantics<parallel>], iteration_bounds = array<i64: 1>, scalar_prefetch = 0 : i64, scratch_operands = 0 : i64, tpu.core_type = #tpu.core_type<tc>, window_params = [{transform_indices = @transform_0, window_bounds = array<i64: 8, 192>}, {pipeline_mode = #tpu.pipeline_mode<synchronous>, transform_indices = @transform_1, window_bounds = array<i64: 192, 128>}, {pipeline_mode = #tpu.pipeline_mode<synchronous>, transform_indices = @transform_2, window_bounds = array<i64: 1, 128>}, {transform_indices = @transform_3, window_bounds = array<i64: 8, 128>}]} {
    %c0 = arith.constant 0 : index
    %c0_0 = arith.constant 0 : index
    %0 = vector.load %arg1[%c0, %c0_0] : memref<8x192xbf16, #tpu.memory_space<vmem>>, vector<8x192xbf16>
    %c0_1 = arith.constant 0 : index
    %c0_2 = arith.constant 0 : index
    %1 = vector.load %arg2[%c0_1, %c0_2] : memref<192x128xbf16, #tpu.memory_space<vmem>>, vector<192x128xbf16>
    %cst = arith.constant dense<0.000000e+00> : vector<8x128xf32>
    %2 = tpu.matmul %0, %1, %cst {dimension_numbers = #tpu.dot_dimension_numbers<[1], [0], [0], [1], [0, 0, 1, 1], [], []>} : vector<8x192xbf16>, vector<192x128xbf16>, vector<8x128xf32> -> vector<8x128xf32>
    %c0_3 = arith.constant 0 : index
    %c0_4 = arith.constant 0 : index
    %3 = vector.load %arg3[%c0_3, %c0_4] : memref<1x128xf32, #tpu.memory_space<vmem>>, vector<1x128xf32>
    %4 = vector.broadcast %3 : vector<1x128xf32> to vector<8x128xf32>
    %5 = arith.addf %2, %4 : vector<8x128xf32>
    %c0_5 = arith.constant 0 : index
    %c0_6 = arith.constant 0 : index
    %6 = vector.load %arg4[%c0_5, %c0_6] : memref<8x128xf32, #tpu.memory_space<vmem>>, vector<8x128xf32>
    tpu.vector_store %arg4[%c0_5, %c0_6], %5 {strides = array<i32>} : memref<8x128xf32, #tpu.memory_space<vmem>>, vector<8x128xf32>,
    return
  }
  func.func @transform_0(%arg0: i32) -> (i32, i32) {
    %c0_i32 = arith.constant 0 : i32
    %c0_i32_0 = arith.constant 0 : i32
    return %arg0, %c0_i32 : i32, i32
  }
  func.func @transform_1(%arg0: i32) -> (i32, i32) {
    %c0_i32 = arith.constant 0 : i32
    %c0_i32_0 = arith.constant 0 : i32
    %c0_i32_1 = arith.constant 0 : i32
    return %c0_i32, %c0_i32_0 : i32, i32
  }
  func.func @transform_2(%arg0: i32) -> (i32, i32) {
    %c0_i32 = arith.constant 0 : i32
    %c0_i32_0 = arith.constant 0 : i32
    %c0_i32_1 = arith.constant 0 : i32
    return %c0_i32, %c0_i32_0 : i32, i32
  }
  func.func @transform_3(%arg0: i32) -> (i32, i32) {
    %c0_i32 = arith.constant 0 : i32
    %c0_i32_0 = arith.constant 0 : i32
    return %arg0, %c0_i32 : i32, i32
  }
}

</mosaic_0001>

<bundles_post_ra>
// kernel: tpu_custom_call.1
= control target key start
LH: loop header
LB: loop body
LE: loop exit
PB: predicated region body
PF: predicated region fallthrough
CT: control target
= control target key end

     0   :  { %8 = vsyncpa [#allocation3], 0  ;;  %s353_s0 = inlined_call_operand.hbm [shape: bf16[8,192], index: 0, kind: input, shape index: {}]   ;;  %s354_s1 = inlined_call_operand.hbm [shape: bf16[192,128], index: 1, kind: input, shape index: {}]   ;;  %s355_s2 = inlined_call_operand.vmem [shape: f32[1,128], index: 2, kind: input, shape index: {}]   ;;  %s356_s3 = inlined_call_operand.hbm [shape: f32[8,128], index: 3, kind: output, shape index: {}]  }
   0x1   :  { %9 = vsyncpa [#allocation6], 0 }
   0x2   :  { %10 = vsyncpa [#allocation4], 0  ;;  %s315_s12 = smov [#allocation2]   ;;  %s316_s14 = smov [#allocation5]  }
   0x3   :  { %s17_s13 = sshll.u32 %s315_s12, 4  ;;  %s26_s15 = sshll.u32 %s316_s14, 4  ;;  %s18_s13 = int_to_ptr.vmem [resolvable:$true] %s17_s13  ;;  %s27_s15 = int_to_ptr.vmem [resolvable:$true] %s26_s15 }
   0x4   :  { %s257_s16 = scalar_lea.vmem %s18_s13, 128  ;;  %p262_p1 = scmp.lt.s32.totalorder %s18_s13, %s18_s13 }
   0x5   :  { %p258_p0 = scmp.ne.s32.totalorder %s18_s13, %s257_s16  ;;  %p263_p2 = scmp.lt.s32.totalorder %s257_s16, %s257_s16 }
   0x7   :  { %p264_p3 = por %p263_p2, %p262_p1 }
   0x9   :  { %p265_p4 = pnand %p264_p3, %p258_p0 }
   0xb   :  { %268 = shalt.err (!%p265_p4)
}
   0xc   :  { %20 = dma.hbm_to_vmem [thread:$0]  %s353_s0, 128, %s18_s13, [#allocation3]  }
   0xd   :  { %s277_s19 = scalar_lea.vmem %s27_s15, 1536  ;;  %p282_p6 = scmp.lt.s32.totalorder %s27_s15, %s27_s15 }
   0xe   :  { %p278_p5 = scmp.ne.s32.totalorder %s27_s15, %s277_s19  ;;  %p283_p7 = scmp.lt.s32.totalorder %s277_s19, %s277_s19 }
  0x10   :  { %p284_p8 = por %p283_p7, %p282_p6 }
  0x12   :  { %p285_p9 = pnand %p284_p8, %p278_p5 }
  0x14   :  { %288 = shalt.err (!%p285_p9)
}
  0x15   :  { %s317_s20 = smov 64   ;;  %s318_s21 = smov 4  }
  0x16   :  { %32 = dma.hbm_to_vmem [thread:$0]  %s354_s1, 1536, %s27_s15, [#allocation6], %s317_s20, %s317_s20, %s318_s21  }
  0x17   :  { %309 = dma.done.wait [#allocation3], 128  }
  0x18   :  { %310 = vsyncadd [#allocation3], 4294967168 }
  0x19   :  { %311 = dma.done.wait [#allocation6], 1536  }
  0x1a   :  { %312 = vsyncadd [#allocation6], 4294965760  ;;  %v319_v0 = vmov 0   ;;  %v235_v1 = vld [vmem:[#allocation5 + $0x38] sm:$0xff]   ;;  %v236_v2 = vld [vmem:[#allocation5 + $0x30] sm:$0xff]   ;;  %vm152_vm0 = vcmask 523264  }
  0x1b   :  { %156 = vmatprep.subr.bf16.mxu0 %v319_v0  ;;  %v237_v3 = vld [vmem:[#allocation5 + $0x28] sm:$0xff]   ;;  %v238_v4 = vld [vmem:[#allocation5 + $0x20] sm:$0xff]   ;;  %v42_v5 = vld [vmem:[#allocation2] sm:$0xff]  ;;  %s320_s24 = smov [#allocation7]  }
  0x1c   :  { %157 = vmatpush1.bf16.msra.mxu0 %v235_v1  ;;  %v215_v6 = vcombine.high %v42_v5, %v42_v5  ;;  %v239_v7 = vld [vmem:[#allocation5 + $0x18] sm:$0xff]   ;;  %v240_v8 = vld [vmem:[#allocation5 + $0x10] sm:$0xff]   ;;  %v241_v9 = vld [vmem:[#allocation5 + $0x8] sm:$0xff]   ;;  %v214_v15 = vcombine.low %v42_v5, %v42_v5  ;;  %s203_s25 = sshll.u32 %s320_s24, 4  ;;  %s204_s25 = int_to_ptr.vmem [resolvable:$true] %s203_s25 }
  0x1d   :  { %158 = vmatprep.subr.bf16.mxu0 %v319_v0  ;;  %v242_v10 = vld [vmem:[#allocation5] sm:$0xff]   ;;  %v243_v11 = vld [vmem:[#allocation5 + $0x58] sm:$0xff]   ;;  %v244_v12 = vld [vmem:[#allocation5 + $0x50] sm:$0xff]   ;;  %s289_s26 = scalar_lea.vmem %s204_s25, 128  ;;  %p294_p11 = scmp.lt.s32.totalorder %s204_s25, %s204_s25 }
  0x1e   :  { %228 = vmatprep.mubr.msk.bf16.mxu0 %vm152_vm0, %v215_v6  ;;  %v245_v13 = vld [vmem:[#allocation5 + $0x48] sm:$0xff]   ;;  %v246_v14 = vld [vmem:[#allocation5 + $0x40] sm:$0xff]   ;;  %v213_v16 = vld [vmem:[%s355_s2] ss:$0 sm:$0xff]  ;;  %p290_p10 = scmp.ne.s32.totalorder %s204_s25, %s289_s26  ;;  %p295_p12 = scmp.lt.s32.totalorder %s289_s26, %s289_s26 }
  0x20   :  { %159 = vmatpush1.bf16.msra.mxu0 %v236_v2  ;;  %p296_p13 = por %p295_p12, %p294_p11 }
  0x21   :  { %160 = vmatprep.subr.bf16.mxu0 %v319_v0 }
  0x22   :  { %p297_p0 = pnand %p296_p13, %p290_p10 }
  0x24   :  { %161 = vmatpush1.bf16.msra.mxu0 %v237_v3 }
  0x25   :  { %162 = vmatprep.subr.bf16.mxu0 %v319_v0 }
  0x28   :  { %163 = vmatpush1.bf16.msra.mxu0 %v238_v4 }
  0x29   :  { %164 = vmatprep.subr.bf16.mxu0 %v319_v0 }
  0x2c   :  { %165 = vmatpush1.bf16.msra.mxu0 %v239_v7 }
  0x2d   :  { %166 = vmatprep.subr.bf16.mxu0 %v319_v0 }
  0x30   :  { %167 = vmatpush1.bf16.msra.mxu0 %v240_v8 }
  0x31   :  { %168 = vmatprep.subr.bf16.mxu0 %v319_v0 }
  0x34   :  { %169 = vmatpush1.bf16.msra.mxu0 %v241_v9 }
  0x35   :  { %170 = vmatprep.subr.bf16.mxu0 %v319_v0 }
  0x38   :  { %171 = vmatpush1.bf16.msra.mxu0 %v242_v10 }
  0x39   :  { %180 = vmatprep.subr.bf16.mxu0 %v319_v0 }
  0x3c   :  { %181 = vmatpush2.bf16.msra.mxu0 %v243_v11 }
  0x3d   :  { %182 = vmatprep.subr.bf16.mxu0 %v319_v0 }
  0x40   :  { %183 = vmatpush2.bf16.msra.mxu0 %v244_v12 }
  0x41   :  { %184 = vmatprep.subr.bf16.mxu0 %v319_v0 }
  0x44   :  { %185 = vmatpush2.bf16.msra.mxu0 %v245_v13 }
  0x45   :  { %186 = vmatprep.subr.bf16.mxu0 %v319_v0 }
  0x48   :  { %187 = vmatpush2.bf16.msra.mxu0 %v246_v14 }
  0x4b   :  { %189 = vmatmul.mubr.bf16.vlgmr.msra.gmra.mxu0 %v214_v15 }
 0x10b   :  { %v190_v17 = vpop.f32.mrf.mxu0 }
 0x10c   :  { %v191_v18 = vadd.f32 %v213_v16, %v190_v17 }
 0x10d   :  { %v192_v19 = vpop.f32.mrf.mxu0 }
 0x10e   :  { %196 = vst [vmem:[#allocation7] sm:$0xff] %v191_v18 }
 0x10f   :  { %v193_v20 = vpop.f32.mrf.mxu0 }
 0x110   :  { %300 = shalt.err (!%p297_p0)
}
 0x111   :  { %206 = dma.vmem_to_hbm [thread:$0]  %s204_s25, 128, %s356_s3, [#allocation4]   ;;  %v194_v21 = vpop.f32.mrf.mxu0 }
 0x112   :  { %313 = dma.done.wait [#allocation4], 128  }
 0x113   :  { %314 = vsyncadd [#allocation4], 4294967168 }
 0x114   :  { %210 = vsyncpa [#allocation3], 1 }
 0x115   :  { %211 = vsyncpa [#allocation6], 1 }
 0x116   :  { %212 = vsyncpa [#allocation4], 1 }

</bundles_post_ra>
